<compile_context>
chip_gen: v6e
topology: v6e:2x2x1
jax: 0.10.0
libtpu: 0.0.40
codegen_flags: <defaults>
</compile_context>

<pallas_src>
import jax
import jax.numpy as jnp
from jax import lax
from jax.experimental import pallas as pl
from jax.experimental.pallas import tpu as pltpu


def _round_up(x, m):
    return ((x + m - 1) // m) * m


def _pairwise_sqdist_kernel(t_row_ref, t_col_ref, sq_i_ref, sq_j_ref, out_ref):
    # ||a-b||^2 = ||a||^2 + ||b||^2 - 2 a.b ; the -2 is folded into the
    # (TM, Rp) operand (exact scaling), norms arrive pre-computed in both
    # layouts, so the epilogue is add + add + max + store only.
    ti = t_row_ref[...] * (-2.0)                           # (TM, Rp)
    tj = t_col_ref[...]                                    # (TN, Rp)
    gram = lax.dot_general(ti, tj, (((1,), (1,)), ((), ())),
                           preferred_element_type=jnp.float32)  # -2 <t_i, t_j>
    d = sq_i_ref[...] + sq_j_ref[...] + gram               # (TM,1)+(1,TN)+(TM,TN)
    # Clamp tiny negatives from cancellation (diagonal ~0).
    out_ref[...] = jnp.maximum(d, 0.0).astype(out_ref.dtype)


def two_word_psd_probe(representations, proj):
    """representations: (num_words, model_dim) f32; proj: (model_dim, probe_rank) f32.

    Returns (num_words, num_words) f32 pairwise squared distances in the
    projected space (same semantics as PyTorch TwoWordPSDProbe.forward).
    """
    num_words, model_dim = representations.shape
    model_dim2, probe_rank = proj.shape
    assert model_dim == model_dim2

    # 128-granularity padding (NOT tile granularity) of N and of the lane dim R.
    n_pad = _round_up(max(num_words, 128), 128)
    r_pad = _round_up(max(probe_rank, 128), 128)

    rep_p = representations
    if n_pad != num_words:
        rep_p = jnp.pad(representations, ((0, n_pad - num_words), (0, 0)))
    proj_p = proj
    if r_pad != probe_rank:
        proj_p = jnp.pad(proj, ((0, 0), (0, r_pad - probe_rank)))

    # Projection + squared norms: microseconds of O(N*D*R) work, done once as
    # fused XLA ops (a dedicated pallas_call here is pure launch overhead).
    t = jnp.dot(rep_p, proj_p, precision=lax.Precision.HIGHEST,
                preferred_element_type=jnp.float32)        # (n_pad, r_pad), lane-dense
    sq_col = jnp.sum(t * t, axis=-1, keepdims=True)        # (n_pad, 1)
    sq_row = sq_col.reshape(1, n_pad)                      # (1, n_pad), lane-major

    # Large lane-dense rectangular output tiles; both divisors of n_pad.
    tm = 256 if n_pad % 256 == 0 else 128
    tn = 128
    for cand in (1024, 512, 256, 128):
        if n_pad % cand == 0:
            tn = cand
            break
    grid = (n_pad // tm, n_pad // tn)

    # VMEM (double-buffered): 2*(tm*r_pad + tn*r_pad + tm*tn)*4B  ~ a few MiB
    # worst case — comfortably inside v7x's 32 MiB scoped / 64 MiB physical.
    cost = pl.CostEstimate(
        flops=2 * n_pad * n_pad * r_pad + 3 * n_pad * n_pad,
        transcendentals=0,
        bytes_accessed=4 * (n_pad * r_pad * (grid[0] + grid[1])   # t re-reads
                            + n_pad * (grid[0] + grid[1])          # norm re-reads
                            + n_pad * n_pad),                      # output
    )

    dists = pl.pallas_call(
        _pairwise_sqdist_kernel,
        out_shape=jax.ShapeDtypeStruct((n_pad, n_pad), jnp.float32),
        grid=grid,
        in_specs=[
            pl.BlockSpec((tm, r_pad), lambda i, j: (i, 0)),   # row operand of Gram
            pl.BlockSpec((tn, r_pad), lambda i, j: (j, 0)),   # col operand of Gram
            pl.BlockSpec((tm, 1), lambda i, j: (i, 0)),       # ||t_i||^2 column
            pl.BlockSpec((1, tn), lambda i, j: (0, j)),       # ||t_j||^2 row
        ],
        out_specs=pl.BlockSpec((tm, tn), lambda i, j: (i, j)),
        compiler_params=pltpu.CompilerParams(
            dimension_semantics=("parallel", "parallel")),
        cost_estimate=cost,
    )(t, t, sq_col, sq_row)

    return dists[:num_words, :num_words]


def _reference(representations, proj):
    t = jnp.dot(representations, proj, precision=lax.Precision.HIGHEST)
    diffs = t[None, :, :] - t[:, None, :]
    return jnp.sum(diffs * diffs, axis=-1)


if __name__ == "__main__":
    # Small shapes consistent with the module: num_words=8, model_dim=32, rank=16.
    num_words, model_dim, probe_rank = 8, 32, 16

    key = jax.random.PRNGKey(0)
    k_rep, k_proj = jax.random.split(key)

    representations = jax.random.normal(
        k_rep, (num_words, model_dim), dtype=jnp.float32)
    # nn.init.uniform_(self.proj, -0.05, 0.05), deterministic here.
    proj = jax.random.uniform(
        k_proj, (model_dim, probe_rank), dtype=jnp.float32,
        minval=-0.05, maxval=0.05)

    out = two_word_psd_probe(representations, proj)
    out = jax.block_until_ready(out)

    ref = _reference(representations, proj)
    assert out.shape == (num_words, num_words)
    assert jnp.allclose(out, ref, atol=1e-5, rtol=1e-5)

    print("KERNEL_OK")
</pallas_src>

<mosaic_0001>
module attributes {stable_mosaic.version = 11 : i64} {
  func.func @_pairwise_sqdist_kernel(%arg0: i32, %arg1: i32, %arg2: memref<128x128xf32, #tpu.memory_space<vmem>>, %arg3: memref<128x128xf32, #tpu.memory_space<vmem>>, %arg4: memref<128x1xf32, #tpu.memory_space<vmem>>, %arg5: memref<1x128xf32, #tpu.memory_space<vmem>>, %arg6: memref<128x128xf32, #tpu.memory_space<vmem>>) attributes {dimension_semantics = [#tpu.dimension_semantics<parallel>, #tpu.dimension_semantics<parallel>], iteration_bounds = array<i64: 1, 1>, scalar_prefetch = 0 : i64, scratch_operands = 0 : i64, tpu.core_type = #tpu.core_type<tc>, window_params = [{transform_indices = @transform_0, window_bounds = array<i64: 128, 128>}, {transform_indices = @transform_1, window_bounds = array<i64: 128, 128>}, {transform_indices = @transform_2, window_bounds = array<i64: 128, 1>}, {transform_indices = @transform_3, window_bounds = array<i64: 1, 128>}, {transform_indices = @transform_4, window_bounds = array<i64: 128, 128>}]} {
    %c0 = arith.constant 0 : index
    %c0_0 = arith.constant 0 : index
    %0 = vector.load %arg2[%c0, %c0_0] : memref<128x128xf32, #tpu.memory_space<vmem>>, vector<128x128xf32>
    %cst = arith.constant -2.000000e+00 : f32
    %1 = vector.broadcast %cst : f32 to vector<128x128xf32>
    %2 = arith.mulf %0, %1 : vector<128x128xf32>
    %c0_1 = arith.constant 0 : index
    %c0_2 = arith.constant 0 : index
    %3 = vector.load %arg3[%c0_1, %c0_2] : memref<128x128xf32, #tpu.memory_space<vmem>>, vector<128x128xf32>
    %cst_3 = arith.constant dense<0.000000e+00> : vector<128x128xf32>
    %4 = tpu.matmul %2, %3, %cst_3 {dimension_numbers = #tpu.dot_dimension_numbers<[1], [1], [0], [0], [0, 0, 1, 0], [], []>} : vector<128x128xf32>, vector<128x128xf32>, vector<128x128xf32> -> vector<128x128xf32>
    %c0_4 = arith.constant 0 : index
    %c0_5 = arith.constant 0 : index
    %5 = vector.load %arg4[%c0_4, %c0_5] : memref<128x1xf32, #tpu.memory_space<vmem>>, vector<128x1xf32>
    %c0_6 = arith.constant 0 : index
    %c0_7 = arith.constant 0 : index
    %6 = vector.load %arg5[%c0_6, %c0_7] : memref<1x128xf32, #tpu.memory_space<vmem>>, vector<1x128xf32>
    %7 = vector.broadcast %5 : vector<128x1xf32> to vector<128x128xf32>
    %8 = vector.broadcast %6 : vector<1x128xf32> to vector<128x128xf32>
    %9 = arith.addf %7, %8 : vector<128x128xf32>
    %10 = arith.addf %9, %4 : vector<128x128xf32>
    %cst_8 = arith.constant 0.000000e+00 : f32
    %11 = vector.broadcast %cst_8 : f32 to vector<128x128xf32>
    %12 = arith.maximumf %10, %11 : vector<128x128xf32>
    %c0_9 = arith.constant 0 : index
    %c0_10 = arith.constant 0 : index
    %13 = vector.load %arg6[%c0_9, %c0_10] : memref<128x128xf32, #tpu.memory_space<vmem>>, vector<128x128xf32>
    tpu.vector_store %arg6[%c0_9, %c0_10], %12 {strides = array<i32>} : memref<128x128xf32, #tpu.memory_space<vmem>>, vector<128x128xf32>,
    return
  }
  func.func @transform_0(%arg0: i32, %arg1: i32) -> (i32, i32) {
    %c0_i32 = arith.constant 0 : i32
    %c0_i32_0 = arith.constant 0 : i32
    return %arg0, %c0_i32 : i32, i32
  }
  func.func @transform_1(%arg0: i32, %arg1: i32) -> (i32, i32) {
    %c0_i32 = arith.constant 0 : i32
    %c0_i32_0 = arith.constant 0 : i32
    return %arg1, %c0_i32 : i32, i32
  }
  func.func @transform_2(%arg0: i32, %arg1: i32) -> (i32, i32) {
    %c0_i32 = arith.constant 0 : i32
    %c0_i32_0 = arith.constant 0 : i32
    return %arg0, %c0_i32 : i32, i32
  }
  func.func @transform_3(%arg0: i32, %arg1: i32) -> (i32, i32) {
    %c0_i32 = arith.constant 0 : i32
    %c0_i32_0 = arith.constant 0 : i32
    return %c0_i32, %arg1 : i32, i32
  }
  func.func @transform_4(%arg0: i32, %arg1: i32) -> (i32, i32) {
    %c0_i32 = arith.constant 0 : i32
    return %arg0, %arg1 : i32, i32
  }
}

</mosaic_0001>

<bundles_post_ra>
// kernel: tpu_custom_call.1
= control target key start
LH: loop header
LB: loop body
LE: loop exit
PB: predicated region body
PF: predicated region fallthrough
CT: control target
= control target key end

     0   :  { %9 = vsyncpa [#allocation3], 0  ;;  %s743_s0 = inlined_call_operand.vmem [shape: f32[128,128], index: 0, kind: input, shape index: {}]   ;;  %s744_s1 = inlined_call_operand.hbm [shape: f32[128,128], index: 1, kind: input, shape index: {}]   ;;  %s745_s2 = inlined_call_operand.vmem [shape: f32[128,1], index: 2, kind: input, shape index: {}]   ;;  %s746_s3 = inlined_call_operand.vmem [shape: f32[1,128], index: 3, kind: input, shape index: {}]   ;;  %s747_s4 = inlined_call_operand.hbm [shape: f32[128,128], index: 4, kind: output, shape index: {}]  }
   0x1   :  { %10 = vsyncpa [#allocation4], 0  ;;  %s581_s15 = smov [#allocation2]  }
   0x2   :  { %s18_s16 = sshll.u32 %s581_s15, 4  ;;  %s19_s16 = int_to_ptr.vmem [resolvable:$true] %s18_s16 }
   0x3   :  { %s545_s17 = scalar_lea.vmem %s19_s16, 2048  ;;  %p550_p1 = scmp.lt.s32.totalorder %s19_s16, %s19_s16 }
   0x4   :  { %p546_p0 = scmp.ne.s32.totalorder %s19_s16, %s545_s17  ;;  %p551_p2 = scmp.lt.s32.totalorder %s545_s17, %s545_s17 }
   0x6   :  { %p552_p3 = por %p551_p2, %p550_p1 }
   0x8   :  { %p553_p4 = pnand %p552_p3, %p546_p0 }
   0xa   :  { %556 = shalt.err (!%p553_p4)
}
   0xb   :  { %s582_s18 = smov 128   ;;  %s583_s19 = smov 8  }
   0xc   :  { %24 = dma.hbm_to_vmem [thread:$0]  %s744_s1, 2048, %s19_s16, [#allocation3], %s582_s18, %s582_s18, %s583_s19  }
   0xd   :  { %577 = dma.done.wait [#allocation3], 2048  }
   0xe   :  { %578 = vsyncadd [#allocation3], 4294965248  ;;  %v584_v0 = vmov 0   ;;  %v79_v1 = vld [vmem:[#allocation2 + $0x78] sm:$0xff]  ;;  %v78_v2 = vld [vmem:[#allocation2 + $0x70] sm:$0xff] }
   0xf   :  { %536 = vset.pattern.permute.xlu1 %v584_v0  ;;  %535 = vset.pattern.permute.xlu0 %v584_v0  ;;  %v77_v3 = vld [vmem:[#allocation2 + $0x68] sm:$0xff]  ;;  %v32_v4 = vld [vmem:[%s743_s0] sm:$0xff]  ;;  %v227_v9 = vld [vmem:[%s745_s2 + $0x10] sm:$0xff] }
  0x10   :  { %442 = vmatprep.subr.mxu0 %v79_v1  ;;  %498 = vmatprep.subr.mxu1 %v79_v1  ;;  %v40_v5 = vld [vmem:[%s743_s0 + $0x40] sm:$0xff]  ;;  %v48_v6 = vmul.f32 -2.0, %v32_v4  ;;  %v75_v11 = vld [vmem:[#allocation2 + $0x58] sm:$0xff]  ;;  %v226_v13 = vld [vmem:[%s745_s2 + $0x8] sm:$0xff] }
  0x11   :  { %443 = vmatpush3.xpose.msra.mxu0 %v79_v1  ;;  %514 = vmatpush3.xpose.msra.mxu1 %v79_v1  ;;  %v56_v7 = vmul.f32 -2.0, %v40_v5  ;;  %v76_v8 = vld [vmem:[#allocation2 + $0x60] sm:$0xff]  ;;  %v228_v12 = vld [vmem:[%s745_s2 + $0x18] sm:$0xff]  ;;  %v74_v14 = vld [vmem:[#allocation2 + $0x50] sm:$0xff] }
  0x12   :  { %444 = vmatprep.subr.mxu0 %v78_v2  ;;  %499 = vmatprep.subr.mxu1 %v78_v2  ;;  %v225_v10 = vld [vmem:[%s745_s2] sm:$0xff]  ;;  %v230_v15 = vld [vmem:[%s745_s2 + $0x28] sm:$0xff]  ;;  %v232_v18 = vld [vmem:[%s745_s2 + $0x38] sm:$0xff] }
  0x13   :  { %474 = vmatprep.mubr.f32.mxu0 %v48_v6  ;;  %486 = vmatprep.mubr.f32.mxu1 %v56_v7  ;;  %v229_v16 = vld [vmem:[%s745_s2 + $0x20] sm:$0xff]  ;;  %v73_v17 = vld [vmem:[#allocation2 + $0x48] sm:$0xff]  ;;  %v231_v19 = vld [vmem:[%s745_s2 + $0x30] sm:$0xff] }
  0x14   :  { %254 = vperm.xlu1 %536, %v227_v9   ;;  %244 = vperm.xlu0 %535, %v225_v10   ;;  %v72_v20 = vld [vmem:[#allocation2 + $0x40] sm:$0xff]  ;;  %v234_v21 = vld [vmem:[%s745_s2 + $0x48] sm:$0xff]  ;;  %v71_v23 = vld [vmem:[#allocation2 + $0x38] sm:$0xff] }
  0x15   :  { %445 = vmatpush3.xpose.msra.mxu0 %v78_v2  ;;  %515 = vmatpush3.xpose.msra.mxu1 %v78_v2  ;;  %v233_v22 = vld [vmem:[%s745_s2 + $0x40] sm:$0xff]  ;;  %v236_v24 = vld [vmem:[%s745_s2 + $0x58] sm:$0xff]  ;;  %v235_v25 = vld [vmem:[%s745_s2 + $0x50] sm:$0xff] }
  0x16   :  { %446 = vmatprep.subr.mxu0 %v77_v3  ;;  %500 = vmatprep.subr.mxu1 %v77_v3  ;;  %v70_v26 = vld [vmem:[#allocation2 + $0x30] sm:$0xff]  ;;  %v238_v27 = vld [vmem:[%s745_s2 + $0x68] sm:$0xff]  ;;  %v237_v28 = vld [vmem:[%s745_s2 + $0x60] sm:$0xff] }
  0x17   :  { %v69_v29 = vld [vmem:[#allocation2 + $0x28] sm:$0xff]  ;;  %v240_v30 = vld [vmem:[%s745_s2 + $0x78] sm:$0xff]  ;;  %v239_v31 = vld [vmem:[%s745_s2 + $0x70] sm:$0xff] }
  0x18   :  { %259 = vperm.xlu1 %536, %v228_v12   ;;  %249 = vperm.xlu0 %535, %v226_v13   ;;  %v68_v32 = vld [vmem:[#allocation2 + $0x20] sm:$0xff]  ;;  %v67_v33 = vld [vmem:[#allocation2 + $0x18] sm:$0xff]  ;;  %v66_v34 = vld [vmem:[#allocation2 + $0x10] sm:$0xff] }
  0x19   :  { %447 = vmatpush3.xpose.msra.mxu0 %v77_v3  ;;  %516 = vmatpush3.xpose.msra.mxu1 %v77_v3  ;;  %v65_v35 = vld [vmem:[#allocation2 + $0x8] sm:$0xff]  ;;  %v64_v36 = vld [vmem:[#allocation2] sm:$0xff]  ;;  %v34_v39 = vld [vmem:[%s743_s0 + $0x10] sm:$0xff] }
  0x1a   :  { %448 = vmatprep.subr.mxu0 %v76_v8  ;;  %501 = vmatprep.subr.mxu1 %v76_v8  ;;  %v33_v37 = vld [vmem:[%s743_s0 + $0x8] sm:$0xff]  ;;  %v42_v40 = vld [vmem:[%s743_s0 + $0x50] sm:$0xff]  ;;  %v50_v43 = vmul.f32 -2.0, %v34_v39  ;;  %v35_v45 = vld [vmem:[%s743_s0 + $0x18] sm:$0xff] }
  0x1b   :  { %v41_v38 = vld [vmem:[%s743_s0 + $0x48] sm:$0xff]  ;;  %v49_v41 = vmul.f32 -2.0, %v33_v37  ;;  %v58_v44 = vmul.f32 -2.0, %v42_v40  ;;  %v43_v46 = vld [vmem:[%s743_s0 + $0x58] sm:$0xff]  ;;  %v36_v47 = vld [vmem:[%s743_s0 + $0x20] sm:$0xff]  ;;  %v51_v49 = vmul.f32 -2.0, %v35_v45 }
  0x1c   :  { %269 = vperm.xlu1 %536, %v230_v15   ;;  %264 = vperm.xlu0 %535, %v229_v16   ;;  %v57_v42 = vmul.f32 -2.0, %v41_v38  ;;  %v44_v48 = vld [vmem:[%s743_s0 + $0x60] sm:$0xff]  ;;  %v59_v50 = vmul.f32 -2.0, %v43_v46  ;;  %v52_v51 = vmul.f32 -2.0, %v36_v47  ;;  %v37_v53 = vld [vmem:[%s743_s0 + $0x28] sm:$0xff]  ;;  %v38_v55 = vld [vmem:[%s743_s0 + $0x30] sm:$0xff] }
  0x1d   :  { %449 = vmatpush3.xpose.msra.mxu0 %v76_v8  ;;  %517 = vmatpush3.xpose.msra.mxu1 %v76_v8  ;;  %v60_v52 = vmul.f32 -2.0, %v44_v48  ;;  %v45_v54 = vld [vmem:[%s743_s0 + $0x68] sm:$0xff]  ;;  %v46_v56 = vld [vmem:[%s743_s0 + $0x70] sm:$0xff]  ;;  %v53_v57 = vmul.f32 -2.0, %v37_v53  ;;  %v54_v59 = vmul.f32 -2.0, %v38_v55  ;;  %v39_v61 = vld [vmem:[%s743_s0 + $0x38] sm:$0xff] }
  0x1e   :  { %450 = vmatprep.subr.mxu0 %v75_v11  ;;  %502 = vmatprep.subr.mxu1 %v75_v11  ;;  %v61_v58 = vmul.f32 -2.0, %v45_v54  ;;  %v62_v60 = vmul.f32 -2.0, %v46_v56  ;;  %v47_v62 = vld [vmem:[%s743_s0 + $0x78] sm:$0xff]  ;;  %v55_v63 = vmul.f32 -2.0, %v39_v61  ;;  %v718_v12 = vld [vmem:[%s746_s3] ss:$0 sm:$0xff] }
  0x1f   :  { %v63_v0 = vmul.f32 -2.0, %v47_v62  ;;  %s585_s3 = smov [#allocation5]  }
  0x20   :  { %279 = vperm.xlu1 %536, %v232_v18   ;;  %274 = vperm.xlu0 %535, %v231_v19   ;;  %s397_s8 = sshll.u32 %s585_s3, 4  ;;  %s398_s8 = int_to_ptr.vmem [resolvable:$true] %s397_s8 }
  0x21   :  { %451 = vmatpush3.xpose.msra.mxu0 %v75_v11  ;;  %518 = vmatpush3.xpose.msra.mxu1 %v75_v11  ;;  %s557_s9 = scalar_lea.vmem %s398_s8, 2048  ;;  %p562_p6 = scmp.lt.s32.totalorder %s398_s8, %s398_s8 }
  0x22   :  { %452 = vmatprep.subr.mxu0 %v74_v14  ;;  %503 = vmatprep.subr.mxu1 %v74_v14  ;;  %p558_p5 = scmp.ne.s32.totalorder %s398_s8, %s557_s9  ;;  %p563_p7 = scmp.lt.s32.totalorder %s557_s9, %s557_s9 }
  0x24   :  { %289 = vperm.xlu1 %536, %v234_v21   ;;  %284 = vperm.xlu0 %535, %v233_v22   ;;  %p564_p8 = por %p563_p7, %p562_p6 }
  0x25   :  { %453 = vmatpush3.xpose.msra.mxu0 %v74_v14  ;;  %519 = vmatpush3.xpose.msra.mxu1 %v74_v14 }
  0x26   :  { %454 = vmatprep.subr.mxu0 %v73_v17  ;;  %504 = vmatprep.subr.mxu1 %v73_v17  ;;  %p565_p9 = pnand %p564_p8, %p558_p5 }
  0x28   :  { %299 = vperm.xlu1 %536, %v236_v24   ;;  %294 = vperm.xlu0 %535, %v235_v25  }
  0x29   :  { %455 = vmatpush3.xpose.msra.mxu0 %v73_v17  ;;  %520 = vmatpush3.xpose.msra.mxu1 %v73_v17 }
  0x2a   :  { %456 = vmatprep.subr.mxu0 %v72_v20  ;;  %505 = vmatprep.subr.mxu1 %v72_v20 }
  0x2c   :  { %309 = vperm.xlu1 %536, %v238_v27   ;;  %304 = vperm.xlu0 %535, %v237_v28  }
  0x2d   :  { %457 = vmatpush3.xpose.msra.mxu0 %v72_v20  ;;  %521 = vmatpush3.xpose.msra.mxu1 %v72_v20 }
  0x2e   :  { %458 = vmatprep.subr.mxu0 %v71_v23  ;;  %506 = vmatprep.subr.mxu1 %v71_v23 }
  0x30   :  { %319 = vperm.xlu1 %536, %v240_v30   ;;  %314 = vperm.xlu0 %535, %v239_v31  }
  0x31   :  { %459 = vmatpush3.xpose.msra.mxu0 %v71_v23  ;;  %522 = vmatpush3.xpose.msra.mxu1 %v71_v23 }
  0x32   :  { %460 = vmatprep.subr.mxu0 %v70_v26  ;;  %507 = vmatprep.subr.mxu1 %v70_v26 }
  0x35   :  { %461 = vmatpush3.xpose.msra.mxu0 %v70_v26  ;;  %523 = vmatpush3.xpose.msra.mxu1 %v70_v26 }
  0x36   :  { %462 = vmatprep.subr.mxu0 %v69_v29  ;;  %508 = vmatprep.subr.mxu1 %v69_v29 }
  0x39   :  { %463 = vmatpush3.xpose.msra.mxu0 %v69_v29  ;;  %524 = vmatpush3.xpose.msra.mxu1 %v69_v29 }
  0x3a   :  { %464 = vmatprep.subr.mxu0 %v68_v32  ;;  %509 = vmatprep.subr.mxu1 %v68_v32 }
  0x3d   :  { %465 = vmatpush3.xpose.msra.mxu0 %v68_v32  ;;  %525 = vmatpush3.xpose.msra.mxu1 %v68_v32 }
  0x3e   :  { %466 = vmatprep.subr.mxu0 %v67_v33  ;;  %510 = vmatprep.subr.mxu1 %v67_v33 }
  0x41   :  { %467 = vmatpush3.xpose.msra.mxu0 %v67_v33  ;;  %526 = vmatpush3.xpose.msra.mxu1 %v67_v33 }
  0x42   :  { %468 = vmatprep.subr.mxu0 %v66_v34  ;;  %511 = vmatprep.subr.mxu1 %v66_v34 }
  0x45   :  { %469 = vmatpush3.xpose.msra.mxu0 %v66_v34  ;;  %527 = vmatpush3.xpose.msra.mxu1 %v66_v34 }
  0x46   :  { %470 = vmatprep.subr.mxu0 %v65_v35  ;;  %512 = vmatprep.subr.mxu1 %v65_v35 }
  0x49   :  { %471 = vmatpush3.xpose.msra.mxu0 %v65_v35  ;;  %528 = vmatpush3.xpose.msra.mxu1 %v65_v35 }
  0x4a   :  { %472 = vmatprep.subr.mxu0 %v64_v36  ;;  %513 = vmatprep.subr.mxu1 %v64_v36 }
  0x4d   :  { %473 = vmatpush3.xpose.msra.mxu0 %v64_v36  ;;  %529 = vmatpush3.xpose.msra.mxu1 %v64_v36 }
  0x50   :  { %475 = vmatmul.mubr.f32.vlgmr.msra.gmra.mxu0 %v49_v41  ;;  %487 = vmatmul.mubr.f32.vlgmr.msra.gmra.mxu1 %v57_v42 }
  0x51   :  { %477 = vmatprep.mubr.f32.mxu0 %v50_v43  ;;  %489 = vmatprep.mubr.f32.mxu1 %v58_v44 }
  0x54   :  { %478 = vmatmul.mubr.f32.gmra.mxu0 %v51_v49  ;;  %490 = vmatmul.mubr.f32.gmra.mxu1 %v59_v50 }
  0x55   :  { %480 = vmatprep.mubr.f32.mxu0 %v52_v51  ;;  %492 = vmatprep.mubr.f32.mxu1 %v60_v52 }
  0x58   :  { %481 = vmatmul.mubr.f32.gmra.mxu0 %v53_v57  ;;  %493 = vmatmul.mubr.f32.gmra.mxu1 %v61_v58 }
  0x59   :  { %483 = vmatprep.mubr.f32.mxu0 %v54_v59  ;;  %495 = vmatprep.mubr.f32.mxu1 %v62_v60 }
  0x5c   :  { %484 = vmatmul.mubr.f32.gmra.mxu0 %v55_v63  ;;  %496 = vmatmul.mubr.f32.gmra.mxu1 %v63_v0 }
  0x8f   :  { %v255_v1 = vpop.permute.xlu1 %254  ;;  %v245_v2 = vpop.permute.xlu0 %244 }
  0x90   :  { %v328_v18 = vadd.f32 %v718_v12, %v245_v2  ;;  %v330_v32 = vadd.f32 %v718_v12, %v255_v1 }
  0x93   :  { %v260_v3 = vpop.permute.xlu1 %259  ;;  %v250_v4 = vpop.permute.xlu0 %249 }
  0x94   :  { %v329_v14 = vadd.f32 %v718_v12, %v250_v4  ;;  %v331_v23 = vadd.f32 %v718_v12, %v260_v3 }
  0x97   :  { %v270_v5 = vpop.permute.xlu1 %269  ;;  %v265_v6 = vpop.permute.xlu0 %264 }
  0x98   :  { %v333_v40 = vadd.f32 %v718_v12, %v270_v5  ;;  %v332_v49 = vadd.f32 %v718_v12, %v265_v6 }
  0x9b   :  { %v280_v7 = vpop.permute.xlu1 %279  ;;  %v713_v8 = vpop.permute.xlu0 %274 }
  0x9c   :  { %v335_v58 = vadd.f32 %v718_v12, %v280_v7  ;;  %v334_v2 = vadd.f32 %v718_v12, %v713_v8 }
  0x9f   :  { %v290_v9 = vpop.permute.xlu1 %289  ;;  %v285_v10 = vpop.permute.xlu0 %284 }
  0xa0   :  { %v337_v15 = vadd.f32 %v718_v12, %v290_v9  ;;  %v336_v19 = vadd.f32 %v718_v12, %v285_v10 }
  0xa3   :  { %v300_v11 = vpop.permute.xlu1 %299  ;;  %v295_v13 = vpop.permute.xlu0 %294 }
  0xa4   :  { %v339_v24 = vadd.f32 %v718_v12, %v300_v11  ;;  %v338_v33 = vadd.f32 %v718_v12, %v295_v13 }
  0xa7   :  { %v310_v20 = vpop.permute.xlu1 %309  ;;  %v305_v27 = vpop.permute.xlu0 %304 }
  0xa8   :  { %v341_v41 = vadd.f32 %v718_v12, %v310_v20  ;;  %v340_v50 = vadd.f32 %v718_v12, %v305_v27 }
  0xab   :  { %v320_v44 = vpop.permute.xlu1 %319  ;;  %v315_v53 = vpop.permute.xlu0 %314 }
  0xac   :  { %v343_v59 = vadd.f32 %v718_v12, %v320_v44  ;;  %v342_v3 = vadd.f32 %v718_v12, %v315_v53 }
 0x110   :  { %v476_v16 = vpop.f32.mrf.mxu0  ;;  %v488_v17 = vpop.f32.mrf.mxu1 }
 0x111   :  { %v345_v21 = vadd.f32 %v476_v16, %v329_v14  ;;  %v353_v22 = vadd.f32 %v488_v17, %v337_v15 }
 0x112   :  { %v146_v25 = vpop.f32.mrf.mxu0  ;;  %v186_v26 = vpop.f32.mrf.mxu1 }
 0x113   :  { %v361_v28 = vmax.f32 %v345_v21, 0.0  ;;  %v369_v29 = vmax.f32 %v353_v22, 0.0  ;;  %v344_v30 = vadd.f32 %v328_v18, %v146_v25  ;;  %v352_v31 = vadd.f32 %v336_v19, %v186_v26 }
 0x114   :  { %v479_v34 = vpop.f32.mrf.mxu0  ;;  %v491_v35 = vpop.f32.mrf.mxu1 }
 0x115   :  { %377 = vst [vmem:[#allocation5 + $0x8] sm:$0xff] %v361_v28  ;;  %385 = vst [vmem:[#allocation5 + $0x48] sm:$0xff] %v369_v29  ;;  %v360_v36 = vmax.f32 %v344_v30, 0.0  ;;  %v368_v37 = vmax.f32 %v352_v31, 0.0  ;;  %v347_v38 = vadd.f32 %v479_v34, %v331_v23  ;;  %v355_v39 = vadd.f32 %v491_v35, %v339_v24 }
 0x116   :  { %v156_v42 = vpop.f32.mrf.mxu0  ;;  %v196_v43 = vpop.f32.mrf.mxu1 }
 0x117   :  { %376 = vst [vmem:[#allocation5] sm:$0xff] %v360_v36  ;;  %384 = vst [vmem:[#allocation5 + $0x40] sm:$0xff] %v368_v37  ;;  %v363_v45 = vmax.f32 %v347_v38, 0.0  ;;  %v371_v46 = vmax.f32 %v355_v39, 0.0  ;;  %v346_v47 = vadd.f32 %v330_v32, %v156_v42  ;;  %v354_v48 = vadd.f32 %v338_v33, %v196_v43 }
 0x118   :  { %v482_v51 = vpop.f32.mrf.mxu0  ;;  %v494_v52 = vpop.f32.mrf.mxu1 }
 0x119   :  { %379 = vst [vmem:[#allocation5 + $0x18] sm:$0xff] %v363_v45  ;;  %387 = vst [vmem:[#allocation5 + $0x58] sm:$0xff] %v371_v46  ;;  %v362_v54 = vmax.f32 %v346_v47, 0.0  ;;  %v370_v55 = vmax.f32 %v354_v48, 0.0  ;;  %v349_v56 = vadd.f32 %v482_v51, %v333_v40  ;;  %v357_v57 = vadd.f32 %v494_v52, %v341_v41 }
 0x11a   :  { %v166_v60 = vpop.f32.mrf.mxu0  ;;  %v206_v61 = vpop.f32.mrf.mxu1 }
 0x11b   :  { %378 = vst [vmem:[#allocation5 + $0x10] sm:$0xff] %v362_v54  ;;  %386 = vst [vmem:[#allocation5 + $0x50] sm:$0xff] %v370_v55  ;;  %v365_v62 = vmax.f32 %v349_v56, 0.0  ;;  %v373_v63 = vmax.f32 %v357_v57, 0.0  ;;  %v348_v0 = vadd.f32 %v332_v49, %v166_v60  ;;  %v356_v1 = vadd.f32 %v340_v50, %v206_v61 }
 0x11c   :  { %v485_v4 = vpop.f32.mrf.mxu0  ;;  %v497_v5 = vpop.f32.mrf.mxu1 }
 0x11d   :  { %381 = vst [vmem:[#allocation5 + $0x28] sm:$0xff] %v365_v62  ;;  %389 = vst [vmem:[#allocation5 + $0x68] sm:$0xff] %v373_v63  ;;  %v364_v6 = vmax.f32 %v348_v0, 0.0  ;;  %v372_v7 = vmax.f32 %v356_v1, 0.0  ;;  %v351_v9 = vadd.f32 %v485_v4, %v335_v58  ;;  %v359_v10 = vadd.f32 %v497_v5, %v343_v59 }
 0x11e   :  { %v176_v11 = vpop.f32.mrf.mxu0  ;;  %v216_v13 = vpop.f32.mrf.mxu1 }
 0x11f   :  { %380 = vst [vmem:[#allocation5 + $0x20] sm:$0xff] %v364_v6  ;;  %388 = vst [vmem:[#allocation5 + $0x60] sm:$0xff] %v372_v7  ;;  %v367_v14 = vmax.f32 %v351_v9, 0.0  ;;  %v375_v15 = vmax.f32 %v359_v10, 0.0  ;;  %v350_v16 = vadd.f32 %v334_v2, %v176_v11  ;;  %v358_v8 = vadd.f32 %v342_v3, %v216_v13 }
 0x121   :  { %383 = vst [vmem:[#allocation5 + $0x38] sm:$0xff] %v367_v14  ;;  %391 = vst [vmem:[#allocation5 + $0x78] sm:$0xff] %v375_v15  ;;  %v366_v12 = vmax.f32 %v350_v16, 0.0  ;;  %v374_v17 = vmax.f32 %v358_v8, 0.0 }
 0x123   :  { %382 = vst [vmem:[#allocation5 + $0x30] sm:$0xff] %v366_v12  ;;  %390 = vst [vmem:[#allocation5 + $0x70] sm:$0xff] %v374_v17 }
 0x124   :  { %568 = shalt.err (!%p565_p9)
}
 0x125   :  { %403 = dma.vmem_to_hbm [thread:$0]  %s398_s8, 2048, %s747_s4, [#allocation4], %s582_s18, %s582_s18, %s583_s19  }
 0x126   :  { %579 = dma.done.wait [#allocation4], 2048  }
 0x127   :  { %580 = vsyncadd [#allocation4], 4294965248 }
 0x128   :  { %407 = vsyncpa [#allocation3], 1 }
 0x129   :  { %408 = vsyncpa [#allocation4], 1 }

</bundles_post_ra>
